<compile_context>
chip_gen: v6e
topology: v6e:2x2x1
jax: 0.10.0
libtpu: 0.0.40
codegen_flags: <defaults>
</compile_context>

<pallas_src>
import functools

import jax
import jax.numpy as jnp
from jax.experimental import pallas as pl
from jax.experimental.pallas import tpu as pltpu


def _round_up(n, m):
    return ((n + m - 1) // m) * m


def _param_offsets(I, H):
    """Row offsets of each parameter inside the packed (rows, H) slab (all 8-aligned)."""
    r_ih = _round_up(I, 8)
    off = {"ih": 0, "hh": r_ih}
    off["b"] = off["hh"] + H
    off["wo"] = off["b"] + 8
    off["bo"] = off["wo"] + H
    off["h0"] = off["bo"] + 8
    off["rows"] = off["h0"] + 8
    return off


def pack_params(w_ih, w_hh, b, w_out, b_out, h0_row):
    """Pack all parameters into one lane-padded f32 slab (single DMA into the kernel).

    w_ih: (I, H), w_hh: (H, H), b: (1, H) fused RNN bias, w_out: (H, O), b_out: (1, O),
    h0_row: (1, H) fixed initial hidden state row.
    """
    I, H = w_ih.shape
    off = _param_offsets(I, H)

    def pad(a, rows):
        a = a.astype(jnp.float32)
        return jnp.pad(a, ((0, rows - a.shape[0]), (0, H - a.shape[1])))

    slab = jnp.concatenate(
        [
            pad(w_ih, _round_up(I, 8)),  # rows [0, r_ih)
            pad(w_hh, H),                # rows [r_ih, r_ih+H)
            pad(b, 8),                   # fused b_ih + b_hh, 1 valid row
            pad(w_out, H),               # lane-padded to H cols (cols >= O are zero)
            pad(b_out, 8),               # 1 valid row, cols >= O are zero
            pad(h0_row, 8),              # 1 valid row
        ],
        axis=0,
    )
    assert slab.shape == (off["rows"], H)
    return slab


def make_automaton_rnn_forward(B, T, I, H, O):
    """Build a jitted forward(x, params_slab) for fixed static shapes."""
    off = _param_offsets(I, H)

    def rnn_kernel(x_ref, p_ref, out_ref):
        # x_ref: (T, B, I) time-major activations.  p_ref: (rows, H) packed parameters.
        # Loop-invariant parameter loads, done exactly once (JAX does not CSE these).
        w_ih = p_ref[off["ih"]:off["ih"] + I, :]        # (I, H)
        w_hh = p_ref[off["hh"]:off["hh"] + H, :]        # (H, H)
        bias = p_ref[off["b"]:off["b"] + 1, :]          # (1, H)  (= b_ih + b_hh)
        w_out = p_ref[off["wo"]:off["wo"] + H, :]       # (H, H), cols >= O are zero
        b_out = p_ref[off["bo"]:off["bo"] + 1, :]       # (1, H), cols >= O are zero
        h0 = p_ref[off["h0"]:off["h0"] + 1, :]          # (1, H)

        bf = jnp.bfloat16
        w_hh_bf = w_hh.astype(bf)

        # Hoisted input projection: all timesteps in one matmul, off the serial critical
        # path.  (T, B, I) -> (T*B, I) collapses leading dims only => layout no-op.
        x_all = x_ref[...].reshape(T * B, I)
        pre_all = jnp.dot(x_all.astype(bf), w_ih.astype(bf),
                          preferred_element_type=jnp.float32) + bias      # (T*B, H) f32

        # Serial recurrence: one small single-pass bf16 MXU dot + f32 add + tanh per step.
        # T is static -> full unroll gives the scheduler visibility to overlap the EUP tanh
        # with the next step's MXU push.
        h = jnp.broadcast_to(h0, (B, H))                                   # (B, H) f32
        for t in range(T):
            pre_t = pre_all[t * B:(t + 1) * B, :]       # contiguous sublane rows for step t
            z = jnp.dot(h.astype(bf), w_hh_bf, preferred_element_type=jnp.float32)
            h = jnp.tanh(z + pre_t)

        # Output head on the final hidden state (lane-padded W_out; keep first O columns).
        logits = jnp.dot(h.astype(bf), w_out.astype(bf),
                         preferred_element_type=jnp.float32) + b_out       # (B, H)
        out_ref[...] = logits[:, :O].astype(out_ref.dtype)

    @jax.jit
    def forward(x, params_slab):
        # x: (B, T, I) batch-first, exactly like the PyTorch module's forward().
        x_tm = jnp.swapaxes(x, 0, 1)  # (T, B, I); compiled inside this jit, not a dispatch
        return pl.pallas_call(
            rnn_kernel,
            out_shape=jax.ShapeDtypeStruct((B, O), jnp.float32),
            in_specs=[
                pl.BlockSpec(memory_space=pltpu.MemorySpace.VMEM),
                pl.BlockSpec(memory_space=pltpu.MemorySpace.VMEM),
            ],
            out_specs=pl.BlockSpec(memory_space=pltpu.MemorySpace.VMEM),
        )(x_tm, params_slab)

    return forward


def reference_forward(x, h0_row, w_ih, w_hh, b, w_out, b_out):
    """Pure-JAX reference with the SAME numerics as the kernel (bf16 dot operands,
    f32 accumulation/adds/tanh).  Implements torch.nn.RNN(tanh, 1 layer, batch_first)
    followed by a Linear head on the last timestep.  Drop the .astype(bf) casts to get
    full-fp32 semantics (then loosen the comparison tolerance)."""
    bf = jnp.bfloat16
    B = x.shape[0]
    H = w_hh.shape[0]
    h = jnp.broadcast_to(h0_row, (B, H)).astype(jnp.float32)

    def step(h, x_t):
        pre = jnp.dot(x_t.astype(bf), w_ih.astype(bf),
                      preferred_element_type=jnp.float32) + b
        z = jnp.dot(h.astype(bf), w_hh.astype(bf),
                    preferred_element_type=jnp.float32)
        return jnp.tanh(z + pre), None

    h_last, _ = jax.lax.scan(step, h, jnp.swapaxes(x, 0, 1))
    return jnp.dot(h_last.astype(bf), w_out.astype(bf),
                   preferred_element_type=jnp.float32) + b_out


if __name__ == "__main__":
    # hidden_size = len(state_encoding) * len(input_encoding) = 4 * 8 = 32
    B, T, I, H, O = 8, 8, 8, 32, 2

    key = jax.random.PRNGKey(0)
    k_x, k_h0, k_wih, k_whh, k_bih, k_bhh, k_wo, k_bo = jax.random.split(key, 8)

    scale = 1.0 / jnp.sqrt(H)
    x = jax.random.normal(k_x, (B, T, I), dtype=jnp.float32)
    # rnn_initial_state: a single fixed (1, H) vector; reset_hidden_state repeats it over batch.
    h0_row = jax.random.uniform(k_h0, (1, H), minval=-1.0, maxval=1.0, dtype=jnp.float32)

    # torch.nn.RNN stores W_ih:[H,I], W_hh:[H,H]; weights are pre-transposed here so the
    # kernel computes x @ W; the two RNN biases are fused into a single (1, H) vector.
    w_ih = jax.random.uniform(k_wih, (I, H), minval=-scale, maxval=scale, dtype=jnp.float32)
    w_hh = jax.random.uniform(k_whh, (H, H), minval=-scale, maxval=scale, dtype=jnp.float32)
    b_ih = jax.random.uniform(k_bih, (1, H), minval=-scale, maxval=scale, dtype=jnp.float32)
    b_hh = jax.random.uniform(k_bhh, (1, H), minval=-scale, maxval=scale, dtype=jnp.float32)
    b = b_ih + b_hh
    w_out = jax.random.uniform(k_wo, (H, O), minval=-scale, maxval=scale, dtype=jnp.float32)
    b_out = jax.random.uniform(k_bo, (1, O), minval=-scale, maxval=scale, dtype=jnp.float32)

    slab = pack_params(w_ih, w_hh, b, w_out, b_out, h0_row)   # one (96, 32) f32 parameter DMA
    forward = make_automaton_rnn_forward(B, T, I, H, O)

    out = jax.block_until_ready(forward(x, slab))

    ref = reference_forward(x, h0_row, w_ih, w_hh, b, w_out, b_out)
    assert out.shape == (B, O)
    # bf16-operand dots in both kernel and reference; residual differences come only from
    # tanh/rounding implementation details, hence the 5e-3 tolerance.
    assert jnp.allclose(out, ref, atol=5e-3, rtol=5e-3), "mismatch vs pure-JAX reference"

    print("KERNEL_OK")
</pallas_src>

<mosaic_0001>
module attributes {stable_mosaic.version = 11 : i64} {
  func.func @rnn_kernel(%arg0: memref<8x8x8xf32, #tpu.memory_space<vmem>>, %arg1: memref<96x32xf32, #tpu.memory_space<vmem>>, %arg2: memref<8x2xf32, #tpu.memory_space<vmem>>) attributes {dimension_semantics = [], scalar_prefetch = 0 : i64, scratch_operands = 0 : i64, tpu.core_type = #tpu.core_type<tc>} {
    %c0 = arith.constant 0 : index
    %c0_0 = arith.constant 0 : index
    %0 = vector.load %arg1[%c0, %c0_0] : memref<96x32xf32, #tpu.memory_space<vmem>>, vector<8x32xf32>
    %c8 = arith.constant 8 : index
    %c0_1 = arith.constant 0 : index
    %1 = vector.load %arg1[%c8, %c0_1] : memref<96x32xf32, #tpu.memory_space<vmem>>, vector<32x32xf32>
    %c40 = arith.constant 40 : index
    %c0_2 = arith.constant 0 : index
    %2 = vector.load %arg1[%c40, %c0_2] : memref<96x32xf32, #tpu.memory_space<vmem>>, vector<1x32xf32>
    %c48 = arith.constant 48 : index
    %c0_3 = arith.constant 0 : index
    %3 = vector.load %arg1[%c48, %c0_3] : memref<96x32xf32, #tpu.memory_space<vmem>>, vector<32x32xf32>
    %c80 = arith.constant 80 : index
    %c0_4 = arith.constant 0 : index
    %4 = vector.load %arg1[%c80, %c0_4] : memref<96x32xf32, #tpu.memory_space<vmem>>, vector<1x32xf32>
    %c88 = arith.constant 88 : index
    %c0_5 = arith.constant 0 : index
    %5 = vector.load %arg1[%c88, %c0_5] : memref<96x32xf32, #tpu.memory_space<vmem>>, vector<1x32xf32>
    %6 = arith.truncf %1 : vector<32x32xf32> to vector<32x32xbf16>
    %c0_6 = arith.constant 0 : index
    %c0_7 = arith.constant 0 : index
    %c0_8 = arith.constant 0 : index
    %7 = vector.load %arg0[%c0_6, %c0_7, %c0_8] : memref<8x8x8xf32, #tpu.memory_space<vmem>>, vector<8x8x8xf32>
    %8 = vector.shape_cast %7 : vector<8x8x8xf32> to vector<64x8xf32>
    %9 = arith.truncf %8 : vector<64x8xf32> to vector<64x8xbf16>
    %10 = arith.truncf %0 : vector<8x32xf32> to vector<8x32xbf16>
    %cst = arith.constant dense<0.000000e+00> : vector<64x32xf32>
    %11 = tpu.matmul %9, %10, %cst {dimension_numbers = #tpu.dot_dimension_numbers<[1], [0], [0], [1], [0, 0, 1, 1], [], []>} : vector<64x8xbf16>, vector<8x32xbf16>, vector<64x32xf32> -> vector<64x32xf32>
    %12 = vector.broadcast %2 : vector<1x32xf32> to vector<64x32xf32>
    %13 = arith.addf %11, %12 : vector<64x32xf32>
    %14 = vector.shape_cast %5 : vector<1x32xf32> to vector<1x32xf32>
    %15 = vector.broadcast %14 : vector<1x32xf32> to vector<8x32xf32>
    %16 = vector.extract_strided_slice %13 {offsets = [0, 0], sizes = [8, 32], strides = [1, 1]} : vector<64x32xf32> to vector<8x32xf32>
    %17 = arith.truncf %15 : vector<8x32xf32> to vector<8x32xbf16>
    %cst_9 = arith.constant dense<0.000000e+00> : vector<8x32xf32>
    %18 = tpu.matmul %17, %6, %cst_9 {dimension_numbers = #tpu.dot_dimension_numbers<[1], [0], [0], [1], [0, 0, 1, 1], [], []>} : vector<8x32xbf16>, vector<32x32xbf16>, vector<8x32xf32> -> vector<8x32xf32>
    %19 = arith.addf %18, %16 : vector<8x32xf32>
    %20 = math.tanh %19 : vector<8x32xf32>
    %21 = vector.extract_strided_slice %13 {offsets = [8, 0], sizes = [8, 32], strides = [1, 1]} : vector<64x32xf32> to vector<8x32xf32>
    %22 = arith.truncf %20 : vector<8x32xf32> to vector<8x32xbf16>
    %cst_10 = arith.constant dense<0.000000e+00> : vector<8x32xf32>
    %23 = tpu.matmul %22, %6, %cst_10 {dimension_numbers = #tpu.dot_dimension_numbers<[1], [0], [0], [1], [0, 0, 1, 1], [], []>} : vector<8x32xbf16>, vector<32x32xbf16>, vector<8x32xf32> -> vector<8x32xf32>
    %24 = arith.addf %23, %21 : vector<8x32xf32>
    %25 = math.tanh %24 : vector<8x32xf32>
    %26 = vector.extract_strided_slice %13 {offsets = [16, 0], sizes = [8, 32], strides = [1, 1]} : vector<64x32xf32> to vector<8x32xf32>
    %27 = arith.truncf %25 : vector<8x32xf32> to vector<8x32xbf16>
    %cst_11 = arith.constant dense<0.000000e+00> : vector<8x32xf32>
    %28 = tpu.matmul %27, %6, %cst_11 {dimension_numbers = #tpu.dot_dimension_numbers<[1], [0], [0], [1], [0, 0, 1, 1], [], []>} : vector<8x32xbf16>, vector<32x32xbf16>, vector<8x32xf32> -> vector<8x32xf32>
    %29 = arith.addf %28, %26 : vector<8x32xf32>
    %30 = math.tanh %29 : vector<8x32xf32>
    %31 = vector.extract_strided_slice %13 {offsets = [24, 0], sizes = [8, 32], strides = [1, 1]} : vector<64x32xf32> to vector<8x32xf32>
    %32 = arith.truncf %30 : vector<8x32xf32> to vector<8x32xbf16>
    %cst_12 = arith.constant dense<0.000000e+00> : vector<8x32xf32>
    %33 = tpu.matmul %32, %6, %cst_12 {dimension_numbers = #tpu.dot_dimension_numbers<[1], [0], [0], [1], [0, 0, 1, 1], [], []>} : vector<8x32xbf16>, vector<32x32xbf16>, vector<8x32xf32> -> vector<8x32xf32>
    %34 = arith.addf %33, %31 : vector<8x32xf32>
    %35 = math.tanh %34 : vector<8x32xf32>
    %36 = vector.extract_strided_slice %13 {offsets = [32, 0], sizes = [8, 32], strides = [1, 1]} : vector<64x32xf32> to vector<8x32xf32>
    %37 = arith.truncf %35 : vector<8x32xf32> to vector<8x32xbf16>
    %cst_13 = arith.constant dense<0.000000e+00> : vector<8x32xf32>
    %38 = tpu.matmul %37, %6, %cst_13 {dimension_numbers = #tpu.dot_dimension_numbers<[1], [0], [0], [1], [0, 0, 1, 1], [], []>} : vector<8x32xbf16>, vector<32x32xbf16>, vector<8x32xf32> -> vector<8x32xf32>
    %39 = arith.addf %38, %36 : vector<8x32xf32>
    %40 = math.tanh %39 : vector<8x32xf32>
    %41 = vector.extract_strided_slice %13 {offsets = [40, 0], sizes = [8, 32], strides = [1, 1]} : vector<64x32xf32> to vector<8x32xf32>
    %42 = arith.truncf %40 : vector<8x32xf32> to vector<8x32xbf16>
    %cst_14 = arith.constant dense<0.000000e+00> : vector<8x32xf32>
    %43 = tpu.matmul %42, %6, %cst_14 {dimension_numbers = #tpu.dot_dimension_numbers<[1], [0], [0], [1], [0, 0, 1, 1], [], []>} : vector<8x32xbf16>, vector<32x32xbf16>, vector<8x32xf32> -> vector<8x32xf32>
    %44 = arith.addf %43, %41 : vector<8x32xf32>
    %45 = math.tanh %44 : vector<8x32xf32>
    %46 = vector.extract_strided_slice %13 {offsets = [48, 0], sizes = [8, 32], strides = [1, 1]} : vector<64x32xf32> to vector<8x32xf32>
    %47 = arith.truncf %45 : vector<8x32xf32> to vector<8x32xbf16>
    %cst_15 = arith.constant dense<0.000000e+00> : vector<8x32xf32>
    %48 = tpu.matmul %47, %6, %cst_15 {dimension_numbers = #tpu.dot_dimension_numbers<[1], [0], [0], [1], [0, 0, 1, 1], [], []>} : vector<8x32xbf16>, vector<32x32xbf16>, vector<8x32xf32> -> vector<8x32xf32>
    %49 = arith.addf %48, %46 : vector<8x32xf32>
    %50 = math.tanh %49 : vector<8x32xf32>
    %51 = vector.extract_strided_slice %13 {offsets = [56, 0], sizes = [8, 32], strides = [1, 1]} : vector<64x32xf32> to vector<8x32xf32>
    %52 = arith.truncf %50 : vector<8x32xf32> to vector<8x32xbf16>
    %cst_16 = arith.constant dense<0.000000e+00> : vector<8x32xf32>
    %53 = tpu.matmul %52, %6, %cst_16 {dimension_numbers = #tpu.dot_dimension_numbers<[1], [0], [0], [1], [0, 0, 1, 1], [], []>} : vector<8x32xbf16>, vector<32x32xbf16>, vector<8x32xf32> -> vector<8x32xf32>
    %54 = arith.addf %53, %51 : vector<8x32xf32>
    %55 = math.tanh %54 : vector<8x32xf32>
    %56 = arith.truncf %55 : vector<8x32xf32> to vector<8x32xbf16>
    %57 = arith.truncf %3 : vector<32x32xf32> to vector<32x32xbf16>
    %cst_17 = arith.constant dense<0.000000e+00> : vector<8x32xf32>
    %58 = tpu.matmul %56, %57, %cst_17 {dimension_numbers = #tpu.dot_dimension_numbers<[1], [0], [0], [1], [0, 0, 1, 1], [], []>} : vector<8x32xbf16>, vector<32x32xbf16>, vector<8x32xf32> -> vector<8x32xf32>
    %59 = vector.broadcast %4 : vector<1x32xf32> to vector<8x32xf32>
    %60 = arith.addf %58, %59 : vector<8x32xf32>
    %61 = vector.extract_strided_slice %60 {offsets = [0, 0], sizes = [8, 2], strides = [1, 1]} : vector<8x32xf32> to vector<8x2xf32>
    %c0_18 = arith.constant 0 : index
    %c0_19 = arith.constant 0 : index
    %62 = vector.load %arg2[%c0_18, %c0_19] : memref<8x2xf32, #tpu.memory_space<vmem>>, vector<8x2xf32>
    tpu.vector_store %arg2[%c0_18, %c0_19], %61 {strides = array<i32>} : memref<8x2xf32, #tpu.memory_space<vmem>>, vector<8x2xf32>,
    return
  }
}

</mosaic_0001>

<bundles_post_ra>
// kernel: forward.1
= control target key start
LH: loop header
LB: loop body
LE: loop exit
PB: predicated region body
PF: predicated region fallthrough
CT: control target
= control target key end

     0   :  { %v695_v0 = vmov 0.0   ;;  %vm56_vm0 = vcmask 1043456   ;;  %vm696_vm1 = vmmov 0   ;;  %vm43_vm2 = vcmask 64512   ;;  %s859_s1 = inlined_call_operand.vmem [shape: f32[96,32], index: 1, kind: input, shape index: {}]   ;;  %s860_s0 = inlined_call_operand.vmem [shape: f32[8,8,8], index: 0, kind: input, shape index: {}]   ;;  %s861_s2 = inlined_call_operand.vmem [shape: f32[8,2], index: 2, kind: output, shape index: {}]  }
   0x1   :  { %604 = vmatprep.subr.bf16.mxu1 %v695_v0  ;;  %v12_v1 = vld [vmem:[%s859_s1] sm:$0xff]  ;;  %v15_v2 = vld [vmem:[%s859_s1 + $0x18] sm:$0xff]  ;;  %608 = vmatprep.mubr.msk.bf16.mxu1 %vm696_vm1, %v695_v0  ;;  %v27_v7 = vld [vmem:[%s860_s0 + $0x8] sm:$0xff]  ;;  %vm130_vm3 = vcmask 261120   ;;  %vm540_vm4 = vcmask 15360  }
   0x2   :  { %v16_v3 = vld [vmem:[%s859_s1 + $0x20] sm:$0xff]  ;;  %v38_v4 = vpack.c.bf16 %v12_v1, %v12_v1  ;;  %v28_v8 = vld [vmem:[%s860_s0 + $0x10] sm:$0xff]  ;;  %v29_v10 = vld [vmem:[%s860_s0 + $0x18] sm:$0xff] }
   0x3   :  { %v724_v5 = vpack.c.bf16 %v16_v3, %v15_v2  ;;  %v26_v6 = vld [vmem:[%s860_s0] sm:$0xff]  ;;  %v13_v11 = vld [vmem:[%s859_s1 + $0x8] sm:$0xff]  ;;  %v14_v12 = vld [vmem:[%s859_s1 + $0x10] sm:$0xff]  ;;  %v35_v14 = vpack.c.bf16 %v29_v10, %v28_v8 }
   0x4   :  { %v34_v9 = vpack.c.bf16 %v27_v7, %v26_v6  ;;  %676 = vmatprep.subr.msk.bf16.mxu0 %vm56_vm0, %v38_v4  ;;  %v58_v13 = vsel %vm56_vm0, %v38_v4, 0  ;;  %v747_v15 = vpack.c.bf16 %v14_v12, %v13_v11  ;;  %v551_v16 = vld [vmem:[%s859_s1 + $0x58] ss:$0 sm:$0xff]  ;;  %v772_v19 = vld [vmem:[%s859_s1 + $0x28] ss:$0 sm:$0xff]  ;;  %v30_v29 = vld [vmem:[%s860_s0 + $0x20] sm:$0xff] }
   0x5   :  { %605 = vmatpush3.bf16.msra.mxu1 %v724_v5  ;;  %595 = vmatpush3.bf16.msra.mxu0 %v58_v13  ;;  %v129_v17 = vpack.c.bf16 %v551_v16, %v551_v16  ;;  %v31_v30 = vld [vmem:[%s860_s0 + $0x28] sm:$0xff]  ;;  %v32_v32 = vld [vmem:[%s860_s0 + $0x30] sm:$0xff]  ;;  %v33_v33 = vld [vmem:[%s860_s0 + $0x38] sm:$0xff] }
   0x6   :  { %596 = vmatprep.mubr.msk.bf16.mxu0 %vm43_vm2, %v34_v9  ;;  %606 = vmatprep.subr.bf16.mxu1 %v695_v0  ;;  %v36_v31 = vpack.c.bf16 %v31_v30, %v30_v29  ;;  %v37_v34 = vpack.c.bf16 %v33_v33, %v32_v32  ;;  %v18_v30 = vld [vmem:[%s859_s1 + $0x30] sm:$0xff] }
   0x7   :  { %620 = vmatprep.subr.bf16.mxu0 %v695_v0 }
   0x8   :  { %597 = vmatmul.mubr.msk.bf16.vlgmr.msra.gmra.mxu0 %vm43_vm2, %v35_v14 }
   0x9   :  { %607 = vmatpush3.bf16.msra.mxu1 %v747_v15  ;;  %621 = vmatpush3.bf16.msra.mxu0 %v724_v5 }
   0xa   :  { %612 = vmatprep.subr.bf16.mxu1 %v695_v0  ;;  %622 = vmatprep.subr.bf16.mxu0 %v695_v0 }
   0xb   :  { %600 = vmatprep.mubr.msk.bf16.mxu0 %vm43_vm2, %v36_v31  ;;  %v19_v31 = vld [vmem:[%s859_s1 + $0x38] sm:$0xff] }
   0xc   :  { %609 = vmatmul.mubr.msk.bf16.vlgmr.msra.gmra.mxu1 %vm130_vm3, %v129_v17  ;;  %v491_v32 = vpack.c.bf16 %v19_v31, %v18_v30 }
   0xd   :  { %613 = vmatpush3.bf16.msra.mxu1 %v724_v5  ;;  %616 = vmatprep.mubr.msk.bf16.mxu1 %vm696_vm1, %v695_v0 }
   0xe   :  { %614 = vmatprep.subr.bf16.mxu1 %v695_v0  ;;  %623 = vmatpush3.bf16.msra.mxu0 %v747_v15 }
   0xf   :  { %636 = vmatprep.subr.bf16.mxu0 %v695_v0 }
  0x10   :  { %601 = vmatmul.mubr.msk.bf16.gmra.mxu0 %vm43_vm2, %v37_v34 }
  0x11   :  { %615 = vmatpush3.bf16.msra.mxu1 %v747_v15  ;;  %624 = vmatprep.mubr.msk.bf16.mxu0 %vm696_vm1, %v695_v0 }
  0x12   :  { %628 = vmatprep.subr.bf16.mxu1 %v695_v0 }
  0xc8   :  { %v598_v18 = vpop.f32.mrf.mxu0 }
  0xc9   :  { %v103_v49 = vadd.f32 %v598_v18, %v772_v19 }
  0xca   :  { %v94_v20 = vpop.f32.mrf.mxu0 }
  0xcb   :  { %v95_v21 = vadd.f32 %v772_v19, %v94_v20 }
  0xcc   :  { %v168_v22 = vpop.f32.mrf.mxu1  ;;  %v599_v35 = vpop.f32.mrf.mxu0 }
  0xcd   :  { %v169_v23 = vadd.f32 %v168_v22, %v95_v21  ;;  %v106_v57 = vadd.f32 %v599_v35, %v772_v19 }
  0xce   :  { %v610_v24 = vpop.f32.mrf.mxu1  ;;  %v97_v36 = vpop.f32.mrf.mxu0 }
  0xcf   :  { %679 = vtanh.f32 %v169_v23  ;;  %v98_v37 = vadd.f32 %v772_v19, %v97_v36 }
  0xd0   :  { %v171_v25 = vpop.f32.mrf.mxu1  ;;  %v602_v45 = vpop.f32.mrf.mxu0 }
  0xd2   :  { %v611_v26 = vpop.f32.mrf.mxu1  ;;  %v110_v46 = vpop.f32.mrf.mxu0 }
  0xd3   :  { %v111_v2 = vadd.f32 %v772_v19, %v110_v46 }
  0xd4   :  { %v806_v47 = vpop.f32.mrf.mxu0 }
  0xd5   :  { %v122_v33 = vadd.f32 %v806_v47, %v772_v19 }
  0xd6   :  { %v113_v48 = vpop.f32.mrf.mxu0 }
  0xd7   :  { %v114_v11 = vadd.f32 %v772_v19, %v113_v48 }
  0xdc   :  { %v680_v27 = vpop.eup %679 }
  0xdd   :  { %v175_v28 = vpack.c.bf16 %v680_v27, %v680_v27  ;;  %v20_v27 = vld [vmem:[%s859_s1 + $0x40] sm:$0xff] }
  0xdf   :  { %617 = vmatmul.mubr.msk.bf16.vlgmr.msra.gmra.mxu1 %vm130_vm3, %v175_v28  ;;  %v21_v28 = vld [vmem:[%s859_s1 + $0x48] sm:$0xff] }
  0xe0   :  { %629 = vmatpush3.bf16.msra.mxu1 %v724_v5  ;;  %632 = vmatprep.mubr.msk.bf16.mxu1 %vm696_vm1, %v695_v0  ;;  %v492_v29 = vpack.c.bf16 %v21_v28, %v20_v27 }
  0xe1   :  { %630 = vmatprep.subr.bf16.mxu1 %v695_v0 }
  0xe4   :  { %631 = vmatpush3.bf16.msra.mxu1 %v747_v15 }
  0xe5   :  { %644 = vmatprep.subr.bf16.mxu1 %v695_v0 }
 0x19f   :  { %v213_v38 = vpop.f32.mrf.mxu1 }
 0x1a0   :  { %v214_v39 = vadd.f32 %v213_v38, %v98_v37 }
 0x1a1   :  { %v618_v40 = vpop.f32.mrf.mxu1 }
 0x1a2   :  { %681 = vtanh.f32 %v214_v39  ;;  %v560_v40 = vld [vmem:[%s859_s1 + $0x50] ss:$0 sm:$0xff] }
 0x1a3   :  { %v216_v41 = vpop.f32.mrf.mxu1 }
 0x1a5   :  { %v619_v42 = vpop.f32.mrf.mxu1 }
 0x1af   :  { %v682_v43 = vpop.eup %681 }
 0x1b0   :  { %v220_v44 = vpack.c.bf16 %v682_v43, %v682_v43 }
 0x1b2   :  { %625 = vmatmul.mubr.msk.bf16.vlgmr.msra.gmra.mxu0 %vm130_vm3, %v220_v44 }
 0x1b3   :  { %637 = vmatpush3.bf16.msra.mxu0 %v724_v5  ;;  %640 = vmatprep.mubr.msk.bf16.mxu0 %vm696_vm1, %v695_v0 }
 0x1b4   :  { %638 = vmatprep.subr.bf16.mxu0 %v695_v0 }
 0x1b7   :  { %639 = vmatpush3.bf16.msra.mxu0 %v747_v15 }
 0x1b8   :  { %652 = vmatprep.subr.bf16.mxu0 %v695_v0 }
 0x272   :  { %v258_v50 = vpop.f32.mrf.mxu0 }
 0x273   :  { %v259_v51 = vadd.f32 %v258_v50, %v103_v49 }
 0x274   :  { %v626_v52 = vpop.f32.mrf.mxu0 }
 0x275   :  { %683 = vtanh.f32 %v259_v51 }
 0x276   :  { %v261_v53 = vpop.f32.mrf.mxu0 }
 0x278   :  { %v627_v54 = vpop.f32.mrf.mxu0 }
 0x282   :  { %v684_v55 = vpop.eup %683 }
 0x283   :  { %v265_v56 = vpack.c.bf16 %v684_v55, %v684_v55 }
 0x285   :  { %633 = vmatmul.mubr.msk.bf16.vlgmr.msra.gmra.mxu1 %vm130_vm3, %v265_v56 }
 0x286   :  { %645 = vmatpush3.bf16.msra.mxu1 %v724_v5  ;;  %648 = vmatprep.mubr.msk.bf16.mxu1 %vm696_vm1, %v695_v0 }
 0x287   :  { %646 = vmatprep.subr.bf16.mxu1 %v695_v0 }
 0x28a   :  { %647 = vmatpush3.bf16.msra.mxu1 %v747_v15 }
 0x28b   :  { %660 = vmatprep.subr.bf16.mxu1 %v695_v0 }
 0x345   :  { %v303_v58 = vpop.f32.mrf.mxu1 }
 0x346   :  { %v304_v59 = vadd.f32 %v303_v58, %v106_v57 }
 0x347   :  { %v634_v60 = vpop.f32.mrf.mxu1 }
 0x348   :  { %685 = vtanh.f32 %v304_v59 }
 0x349   :  { %v306_v61 = vpop.f32.mrf.mxu1 }
 0x34b   :  { %v635_v62 = vpop.f32.mrf.mxu1 }
 0x355   :  { %v686_v63 = vpop.eup %685 }
 0x356   :  { %v310_v1 = vpack.c.bf16 %v686_v63, %v686_v63 }
 0x358   :  { %641 = vmatmul.mubr.msk.bf16.vlgmr.msra.gmra.mxu0 %vm130_vm3, %v310_v1 }
 0x359   :  { %653 = vmatpush3.bf16.msra.mxu0 %v724_v5  ;;  %656 = vmatprep.mubr.msk.bf16.mxu0 %vm696_vm1, %v695_v0 }
 0x35a   :  { %654 = vmatprep.subr.bf16.mxu0 %v695_v0 }
 0x35d   :  { %655 = vmatpush3.bf16.msra.mxu0 %v747_v15 }
 0x35e   :  { %668 = vmatprep.subr.bf16.mxu0 %v695_v0 }
 0x418   :  { %v348_v3 = vpop.f32.mrf.mxu0 }
 0x419   :  { %v349_v4 = vadd.f32 %v348_v3, %v111_v2 }
 0x41a   :  { %v642_v6 = vpop.f32.mrf.mxu0 }
 0x41b   :  { %687 = vtanh.f32 %v349_v4 }
 0x41c   :  { %v351_v7 = vpop.f32.mrf.mxu0 }
 0x41e   :  { %v643_v8 = vpop.f32.mrf.mxu0 }
 0x428   :  { %v688_v9 = vpop.eup %687 }
 0x429   :  { %v355_v10 = vpack.c.bf16 %v688_v9, %v688_v9 }
 0x42b   :  { %649 = vmatmul.mubr.msk.bf16.vlgmr.msra.gmra.mxu1 %vm130_vm3, %v355_v10 }
 0x42c   :  { %661 = vmatpush3.bf16.msra.mxu1 %v724_v5  ;;  %664 = vmatprep.mubr.msk.bf16.mxu1 %vm696_vm1, %v695_v0  ;;  %v119_v5 = vadd.f32 %v602_v45, %v772_v19 }
 0x42d   :  { %662 = vmatprep.subr.bf16.mxu1 %v695_v0 }
 0x430   :  { %663 = vmatpush3.bf16.msra.mxu1 %v747_v15 }
 0x4eb   :  { %v393_v12 = vpop.f32.mrf.mxu1 }
 0x4ec   :  { %v394_v13 = vadd.f32 %v393_v12, %v114_v11 }
 0x4ed   :  { %v650_v14 = vpop.f32.mrf.mxu1 }
 0x4ee   :  { %689 = vtanh.f32 %v394_v13 }
 0x4ef   :  { %v396_v16 = vpop.f32.mrf.mxu1 }
 0x4f1   :  { %v651_v17 = vpop.f32.mrf.mxu1 }
 0x4fb   :  { %v690_v18 = vpop.eup %689 }
 0x4fc   :  { %v400_v20 = vpack.c.bf16 %v690_v18, %v690_v18 }
 0x4fe   :  { %657 = vmatmul.mubr.msk.bf16.vlgmr.msra.gmra.mxu0 %vm130_vm3, %v400_v20 }
 0x4ff   :  { %672 = vmatprep.mubr.msk.bf16.mxu0 %vm696_vm1, %v695_v0  ;;  %669 = vmatpush3.bf16.msra.mxu0 %v492_v29 }
 0x500   :  { %670 = vmatprep.subr.bf16.mxu0 %v695_v0 }
 0x503   :  { %671 = vmatpush3.bf16.msra.mxu0 %v491_v32 }
 0x5be   :  { %v438_v21 = vpop.f32.mrf.mxu0 }
 0x5bf   :  { %v439_v22 = vadd.f32 %v438_v21, %v119_v5 }
 0x5c0   :  { %v658_v15 = vpop.f32.mrf.mxu0 }
 0x5c1   :  { %691 = vtanh.f32 %v439_v22 }
 0x5c2   :  { %v441_v23 = vpop.f32.mrf.mxu0 }
 0x5c4   :  { %v659_v24 = vpop.f32.mrf.mxu0 }
 0x5ce   :  { %v692_v25 = vpop.eup %691 }
 0x5cf   :  { %v445_v26 = vpack.c.bf16 %v692_v25, %v692_v25 }
 0x5d1   :  { %665 = vmatmul.mubr.msk.bf16.vlgmr.msra.gmra.mxu1 %vm130_vm3, %v445_v26 }
 0x691   :  { %v483_v34 = vpop.f32.mrf.mxu1 }
 0x692   :  { %v484_v35 = vadd.f32 %v483_v34, %v122_v33 }
 0x693   :  { %v666_v36 = vpop.f32.mrf.mxu1 }
 0x694   :  { %693 = vtanh.f32 %v484_v35 }
 0x695   :  { %v486_v37 = vpop.f32.mrf.mxu1 }
 0x697   :  { %v667_v38 = vpop.f32.mrf.mxu1 }
 0x6a1   :  { %v694_v0 = vpop.eup %693 }
 0x6a2   :  { %v490_v39 = vpack.c.bf16 %v694_v0, %v694_v0 }
 0x6a4   :  { %673 = vmatmul.mubr.msk.bf16.vlgmr.msra.gmra.mxu0 %vm130_vm3, %v490_v39 }
 0x764   :  { %v534_v41 = vpop.f32.mrf.mxu0 }
 0x765   :  { %v535_v42 = vadd.f32 %v560_v40, %v534_v41 }
 0x766   :  { %v674_v43 = vpop.f32.mrf.mxu0 }
 0x767   :  { %541 = vst.msk [vmem:[%s861_s2] sm:$0xff] %vm540_vm4, %v535_v42 }
 0x768   :  { %v537_v19 = vpop.f32.mrf.mxu0 }
 0x76a   :  { %v675_v44 = vpop.f32.mrf.mxu0 }

</bundles_post_ra>
